<compile_context>
chip_gen: v5e
topology: v5e:2x2
jax: 0.10.0
libtpu: 0.0.40
codegen_flags: <defaults>
</compile_context>

<pallas_src>
import functools

import jax
import jax.numpy as jnp
import numpy as np
from jax.experimental import pallas as pl
from jax.experimental.pallas import tpu as pltpu

LANE = 128


def _round_up(n, m):
    return ((n + m - 1) // m) * m


# ----------------------------------------------------------------------------
# Kernel 1: rescale + 3x3 conv (banded MXU matmuls) + SiLU + global mean pool
# ----------------------------------------------------------------------------
def _conv_silu_pool_kernel(x_ref, bmat_ref, bcol_ref, g_ref, pool_ref, *, H):
    """One batch item: emit a lane-dense (1, CPAD) mean-pooled feature."""
    ncol = bmat_ref.shape[2]                       # W * ch (multiple of 128)

    # Fused rescale; 0.5 halo / lane padding maps to exactly 0, matching
    # Conv2d zero padding applied after rescale.
    win = (x_ref[0, 0] - 0.5) * 2.0                # (H+2, Wp)

    # 3x3 conv (1 input channel) as 3 MXU matmuls, one per vertical tap.
    # bmat[di][w+dj, c*W+w] = K[c, di, dj]; result is (H, W*ch), fully
    # lane-dense, so no im2col relayout and no wasted SiLU/pool lanes.
    acc = jnp.dot(win[0:H, :], bmat_ref[0], preferred_element_type=jnp.float32)
    for di in range(1, 3):                         # fixed 3-iteration loop
        acc = acc + jnp.dot(win[di:di + H, :], bmat_ref[di],
                            preferred_element_type=jnp.float32)
    acc = acc + bcol_ref[...]                      # conv bias per column
    act = acc * jax.nn.sigmoid(acc)                # SiLU (every lane live)

    rowsum = jnp.sum(act, axis=0, keepdims=True)   # (1, W*ch) sublane reduce
    # Per-channel sum over W + the 1/(H*W) mean are folded into the gather
    # matrix g (W*ch, CPAD); output lands lane-dense with channels on lanes.
    pool_ref[0] = jnp.dot(rowsum, g_ref[...],
                          preferred_element_type=jnp.float32)   # (1, CPAD)


# ----------------------------------------------------------------------------
# Kernel 2: batched linear head  (B, CPAD) @ (CPAD, LPAD) + bias
# ----------------------------------------------------------------------------
def _head_kernel(p_ref, wh_ref, bh_ref, o_ref):
    o_ref[...] = (jnp.dot(p_ref[...], wh_ref[...],
                          preferred_element_type=jnp.float32) + bh_ref[...])


def dae_encode(x, w_conv, b_conv, w_head, b_head):
    """x: (B, C, H, W) float32 in [0, 1] -> cond latent (B, latent_dim)."""
    B, _, H, W = x.shape
    ch = w_conv.shape[0]
    latent_dim = w_head.shape[1]
    CPAD = _round_up(ch, LANE)
    LPAD = _round_up(latent_dim, LANE)
    Wp = _round_up(W + 2, LANE)                    # lane-aligned halo'd width
    NCOL = W * ch                                  # activation column count

    # Channel select + 1-pixel spatial halo + lane padding.  Pad value 0.5
    # becomes exactly 0 after the in-kernel rescale (x - 0.5) * 2.
    xpad = jnp.pad(x[:, 0:1].astype(jnp.float32),
                   ((0, 0), (0, 0), (1, 1), (1, Wp - W - 1)),
                   constant_values=0.5)

    # Banded conv weights: bmat[di][w+dj, c*W+w] = w_conv[c, 0, di, dj].
    eye_w = jnp.eye(W, dtype=jnp.float32)
    blocks = []
    for di in range(3):
        blk = jnp.zeros((Wp, ch, W), jnp.float32)
        for dj in range(3):
            shift = jnp.zeros((Wp, W), jnp.float32).at[dj:dj + W, :].set(eye_w)
            blk = blk + w_conv[:, 0, di, dj][None, :, None] * shift[:, None, :]
        blocks.append(blk.reshape(Wp, NCOL))
    bmat = jnp.stack(blocks, axis=0)               # (3, Wp, NCOL)

    # Conv bias replicated per column (column index = c*W + w).
    bcol = jnp.broadcast_to(b_conv[:, None], (ch, W)).reshape(1, NCOL)
    # Pooling gather matrix with the global-mean scale folded in.
    gpool = jnp.zeros((NCOL, CPAD), jnp.float32).at[:, :ch].set(
        jnp.repeat(jnp.eye(ch, dtype=jnp.float32), W, axis=0) / float(H * W))
    # Head weights, lane-padded.
    w_hd = jnp.zeros((CPAD, LPAD), jnp.float32).at[:ch, :latent_dim].set(w_head)
    b_hd = jnp.zeros((1, LPAD), jnp.float32).at[0, :latent_dim].set(b_head)

    kernel = functools.partial(_conv_silu_pool_kernel, H=H)
    pooled = pl.pallas_call(
        kernel,
        out_shape=jax.ShapeDtypeStruct((B, 1, CPAD), jnp.float32),
        grid=(B,),
        in_specs=[
            # per-batch halo'd image block
            pl.BlockSpec((1, 1, H + 2, Wp), lambda b: (b, 0, 0, 0)),
            # weights: constant index maps -> DMA'd once, VMEM resident
            pl.BlockSpec((3, Wp, NCOL), lambda b: (0, 0, 0)),
            pl.BlockSpec((1, NCOL), lambda b: (0, 0)),
            pl.BlockSpec((NCOL, CPAD), lambda b: (0, 0)),
        ],
        out_specs=pl.BlockSpec((1, 1, CPAD), lambda b: (b, 0, 0)),
        compiler_params=pltpu.CompilerParams(
            dimension_semantics=("parallel",),
            vmem_limit_bytes=32 * 1024 * 1024),
    )(xpad, bmat, bcol, gpool)

    pooled2d = pooled[:, 0, :]                     # (B, CPAD), lane-dense

    latent = pl.pallas_call(
        _head_kernel,
        out_shape=jax.ShapeDtypeStruct((B, LPAD), jnp.float32),
        grid=(1,),
        in_specs=[
            pl.BlockSpec((B, CPAD), lambda i: (0, 0)),
            pl.BlockSpec((CPAD, LPAD), lambda i: (0, 0)),
            pl.BlockSpec((1, LPAD), lambda i: (0, 0)),
        ],
        out_specs=pl.BlockSpec((B, LPAD), lambda i: (0, 0)),
        compiler_params=pltpu.CompilerParams(
            dimension_semantics=("arbitrary",)),
    )(pooled2d, w_hd, b_hd)

    return latent[:, :latent_dim]


# ----------------------------------------------------------------------------
# Module wrapper
# ----------------------------------------------------------------------------
class DAECheXpertPallas:
    """Inference-only DAECheXpert: forward == semantic-encoder encode path."""

    def __init__(self, key, ch=32, latent_dim=32):
        k1, k2, k3, k4 = jax.random.split(key, 4)
        # Conv2d(1, ch, 3, padding=1): weight (ch, 1, 3, 3), bias (ch,)
        self.w_conv = jax.random.normal(k1, (ch, 1, 3, 3), jnp.float32) * 0.1
        self.b_conv = jax.random.normal(k2, (ch,), jnp.float32) * 0.01
        # Linear(ch, latent_dim)
        self.w_head = jax.random.normal(k3, (ch, latent_dim), jnp.float32) * 0.1
        self.b_head = jax.random.normal(k4, (latent_dim,), jnp.float32) * 0.01

    def encode(self, x):
        return dae_encode(x, self.w_conv, self.b_conv, self.w_head, self.b_head)

    def __call__(self, x):
        # forward(x) = self.model(x); here we expose the encoder forward.
        return self.encode(x)


# ----------------------------------------------------------------------------
# Pure-JAX reference (for correctness verification)
# ----------------------------------------------------------------------------
def _encode_reference(x, w_conv, b_conv, w_head, b_head):
    y = (x[:, 0:1] - 0.5) * 2.0                            # (B,1,H,W)
    yp = jnp.pad(y, ((0, 0), (0, 0), (1, 1), (1, 1)))
    B, _, H, W = x.shape
    ch = w_conv.shape[0]
    conv = jnp.zeros((B, ch, H, W), jnp.float32)
    for di in range(3):
        for dj in range(3):
            patch = yp[:, 0, di:di + H, dj:dj + W]         # (B,H,W)
            conv = conv + patch[:, None] * w_conv[:, 0, di, dj][None, :, None, None]
    conv = conv + b_conv[None, :, None, None]
    act = conv * jax.nn.sigmoid(conv)
    pooled = act.mean(axis=(2, 3))                         # (B, ch)
    return jnp.dot(pooled, w_head,
                   precision=jax.lax.Precision.HIGHEST) + b_head


if __name__ == "__main__":
    key = jax.random.PRNGKey(0)
    k_x, k_p = jax.random.split(key)
    B, C, H, W = 2, 4, 16, 16
    # inputs in [0, 1] as asserted by rescale()
    x = jax.random.uniform(k_x, (B, C, H, W), jnp.float32, 0.0, 1.0)

    model = DAECheXpertPallas(k_p, ch=32, latent_dim=32)
    cond = model(x)
    jax.block_until_ready(cond)
    assert cond.shape == (B, 32) and cond.dtype == jnp.float32

    ref = _encode_reference(x, model.w_conv, model.b_conv,
                            model.w_head, model.b_head)
    np.testing.assert_allclose(np.asarray(cond), np.asarray(ref),
                               atol=1e-3, rtol=1e-3)
    print("KERNEL_OK")
</pallas_src>

<mosaic_0001>
module attributes {stable_mosaic.version = 11 : i64} {
  func.func @_conv_silu_pool_kernel(%arg0: i32, %arg1: memref<1x1x18x128xf32, #tpu.memory_space<vmem>>, %arg2: memref<3x128x512xf32, #tpu.memory_space<vmem>>, %arg3: memref<1x512xf32, #tpu.memory_space<vmem>>, %arg4: memref<512x128xf32, #tpu.memory_space<vmem>>, %arg5: memref<1x1x128xf32, #tpu.memory_space<vmem>>) attributes {dimension_semantics = [#tpu.dimension_semantics<parallel>], iteration_bounds = array<i64: 2>, scalar_prefetch = 0 : i64, scratch_operands = 0 : i64, tpu.core_type = #tpu.core_type<tc>, window_params = [{transform_indices = @transform_0, window_bounds = array<i64: 1, 1, 18, 128>}, {pipeline_mode = #tpu.pipeline_mode<synchronous>, transform_indices = @transform_1, window_bounds = array<i64: 3, 128, 512>}, {pipeline_mode = #tpu.pipeline_mode<synchronous>, transform_indices = @transform_2, window_bounds = array<i64: 1, 512>}, {pipeline_mode = #tpu.pipeline_mode<synchronous>, transform_indices = @transform_3, window_bounds = array<i64: 512, 128>}, {transform_indices = @transform_4, window_bounds = array<i64: 1, 1, 128>}]} {
    %c0 = arith.constant 0 : index
    %c0_0 = arith.constant 0 : index
    %c0_1 = arith.constant 0 : index
    %c0_2 = arith.constant 0 : index
    %0 = vector.load %arg1[%c0, %c0_0, %c0_1, %c0_2] : memref<1x1x18x128xf32, #tpu.memory_space<vmem>>, vector<1x1x18x128xf32>
    %1 = vector.shape_cast %0 : vector<1x1x18x128xf32> to vector<18x128xf32>
    %cst = arith.constant 5.000000e-01 : f32
    %2 = vector.broadcast %cst : f32 to vector<18x128xf32>
    %3 = arith.subf %1, %2 : vector<18x128xf32>
    %cst_3 = arith.constant 2.000000e+00 : f32
    %4 = vector.broadcast %cst_3 : f32 to vector<18x128xf32>
    %5 = arith.mulf %3, %4 : vector<18x128xf32>
    %6 = vector.extract_strided_slice %5 {offsets = [0, 0], sizes = [16, 128], strides = [1, 1]} : vector<18x128xf32> to vector<16x128xf32>
    %c0_4 = arith.constant 0 : index
    %c0_5 = arith.constant 0 : index
    %c0_6 = arith.constant 0 : index
    %7 = vector.load %arg2[%c0_4, %c0_5, %c0_6] : memref<3x128x512xf32, #tpu.memory_space<vmem>>, vector<1x128x512xf32>
    %8 = vector.shape_cast %7 : vector<1x128x512xf32> to vector<128x512xf32>
    %cst_7 = arith.constant dense<0.000000e+00> : vector<16x512xf32>
    %9 = tpu.matmul %6, %8, %cst_7 {dimension_numbers = #tpu.dot_dimension_numbers<[1], [0], [0], [1], [0, 0, 1, 1], [], []>} : vector<16x128xf32>, vector<128x512xf32>, vector<16x512xf32> -> vector<16x512xf32>
    %10 = vector.extract_strided_slice %5 {offsets = [1, 0], sizes = [16, 128], strides = [1, 1]} : vector<18x128xf32> to vector<16x128xf32>
    %c1 = arith.constant 1 : index
    %c0_8 = arith.constant 0 : index
    %c0_9 = arith.constant 0 : index
    %11 = vector.load %arg2[%c1, %c0_8, %c0_9] : memref<3x128x512xf32, #tpu.memory_space<vmem>>, vector<1x128x512xf32>
    %12 = vector.shape_cast %11 : vector<1x128x512xf32> to vector<128x512xf32>
    %cst_10 = arith.constant dense<0.000000e+00> : vector<16x512xf32>
    %13 = tpu.matmul %10, %12, %cst_10 {dimension_numbers = #tpu.dot_dimension_numbers<[1], [0], [0], [1], [0, 0, 1, 1], [], []>} : vector<16x128xf32>, vector<128x512xf32>, vector<16x512xf32> -> vector<16x512xf32>
    %14 = arith.addf %9, %13 : vector<16x512xf32>
    %15 = vector.extract_strided_slice %5 {offsets = [2, 0], sizes = [16, 128], strides = [1, 1]} : vector<18x128xf32> to vector<16x128xf32>
    %c2 = arith.constant 2 : index
    %c0_11 = arith.constant 0 : index
    %c0_12 = arith.constant 0 : index
    %16 = vector.load %arg2[%c2, %c0_11, %c0_12] : memref<3x128x512xf32, #tpu.memory_space<vmem>>, vector<1x128x512xf32>
    %17 = vector.shape_cast %16 : vector<1x128x512xf32> to vector<128x512xf32>
    %cst_13 = arith.constant dense<0.000000e+00> : vector<16x512xf32>
    %18 = tpu.matmul %15, %17, %cst_13 {dimension_numbers = #tpu.dot_dimension_numbers<[1], [0], [0], [1], [0, 0, 1, 1], [], []>} : vector<16x128xf32>, vector<128x512xf32>, vector<16x512xf32> -> vector<16x512xf32>
    %19 = arith.addf %14, %18 : vector<16x512xf32>
    %c0_14 = arith.constant 0 : index
    %c0_15 = arith.constant 0 : index
    %20 = vector.load %arg3[%c0_14, %c0_15] : memref<1x512xf32, #tpu.memory_space<vmem>>, vector<1x512xf32>
    %21 = vector.broadcast %20 : vector<1x512xf32> to vector<16x512xf32>
    %22 = arith.addf %19, %21 : vector<16x512xf32>
    %23 = arith.negf %22 : vector<16x512xf32>
    %24 = math.exp %23 : vector<16x512xf32>
    %cst_16 = arith.constant 1.000000e+00 : f32
    %25 = vector.broadcast %cst_16 : f32 to vector<16x512xf32>
    %26 = arith.addf %25, %24 : vector<16x512xf32>
    %27 = arith.divf %25, %26 : vector<16x512xf32>
    %28 = arith.mulf %22, %27 : vector<16x512xf32>
    %cst_17 = arith.constant dense<0.000000e+00> : vector<512xf32>
    %29 = vector.multi_reduction <add>, %28, %cst_17 [0] : vector<16x512xf32> to vector<512xf32>
    %30 = vector.shape_cast %29 : vector<512xf32> to vector<1x512xf32>
    %c0_18 = arith.constant 0 : index
    %c0_19 = arith.constant 0 : index
    %31 = vector.load %arg4[%c0_18, %c0_19] : memref<512x128xf32, #tpu.memory_space<vmem>>, vector<512x128xf32>
    %cst_20 = arith.constant dense<0.000000e+00> : vector<1x128xf32>
    %32 = tpu.matmul %30, %31, %cst_20 {dimension_numbers = #tpu.dot_dimension_numbers<[1], [0], [0], [1], [0, 0, 1, 1], [], []>} : vector<1x512xf32>, vector<512x128xf32>, vector<1x128xf32> -> vector<1x128xf32>
    %c0_21 = arith.constant 0 : index
    %c0_22 = arith.constant 0 : index
    %c0_23 = arith.constant 0 : index
    %33 = vector.load %arg5[%c0_21, %c0_22, %c0_23] : memref<1x1x128xf32, #tpu.memory_space<vmem>>, vector<1x1x128xf32>
    %34 = vector.shape_cast %33 : vector<1x1x128xf32> to vector<1x128xf32>
    %35 = vector.shape_cast %32 : vector<1x128xf32> to vector<1x1x128xf32>
    tpu.vector_store %arg5[%c0_21, %c0_22, %c0_23], %35 {strides = array<i32>} : memref<1x1x128xf32, #tpu.memory_space<vmem>>, vector<1x1x128xf32>,
    return
  }
  func.func @transform_0(%arg0: i32) -> (i32, i32, i32, i32) {
    %c0_i32 = arith.constant 0 : i32
    %c0_i32_0 = arith.constant 0 : i32
    %c0_i32_1 = arith.constant 0 : i32
    %c0_i32_2 = arith.constant 0 : i32
    return %arg0, %c0_i32, %c0_i32_0, %c0_i32_1 : i32, i32, i32, i32
  }
  func.func @transform_1(%arg0: i32) -> (i32, i32, i32) {
    %c0_i32 = arith.constant 0 : i32
    %c0_i32_0 = arith.constant 0 : i32
    %c0_i32_1 = arith.constant 0 : i32
    %c0_i32_2 = arith.constant 0 : i32
    return %c0_i32, %c0_i32_0, %c0_i32_1 : i32, i32, i32
  }
  func.func @transform_2(%arg0: i32) -> (i32, i32) {
    %c0_i32 = arith.constant 0 : i32
    %c0_i32_0 = arith.constant 0 : i32
    %c0_i32_1 = arith.constant 0 : i32
    return %c0_i32, %c0_i32_0 : i32, i32
  }
  func.func @transform_3(%arg0: i32) -> (i32, i32) {
    %c0_i32 = arith.constant 0 : i32
    %c0_i32_0 = arith.constant 0 : i32
    %c0_i32_1 = arith.constant 0 : i32
    return %c0_i32, %c0_i32_0 : i32, i32
  }
  func.func @transform_4(%arg0: i32) -> (i32, i32, i32) {
    %c0_i32 = arith.constant 0 : i32
    %c0_i32_0 = arith.constant 0 : i32
    %c0_i32_1 = arith.constant 0 : i32
    return %arg0, %c0_i32, %c0_i32_0 : i32, i32, i32
  }
}

</mosaic_0001>

<bundles_post_ra>
// kernel: tpu_custom_call.1
= control target key start
LH: loop header
LB: loop body
LE: loop exit
PB: predicated region body
PF: predicated region fallthrough
CT: control target
= control target key end

     0   :  { %9 = vsyncpa [#allocation3], 0  ;;  %s1835_s0 = inlined_call_operand.vmem [shape: f32[2,1,18,128], index: 0, kind: input, shape index: {}]   ;;  %s1836_s1 = inlined_call_operand.hbm [shape: f32[3,128,512], index: 1, kind: input, shape index: {}]   ;;  %s1837_s2 = inlined_call_operand.vmem [shape: f32[1,512], index: 2, kind: input, shape index: {}]   ;;  %s1838_s3 = inlined_call_operand.hbm [shape: f32[512,128], index: 3, kind: input, shape index: {}]   ;;  %s1839_s4 = inlined_call_operand.hbm [shape: f32[2,1,128], index: 4, kind: output, shape index: {}]  }
   0x1   :  { %10 = vsyncpa [#allocation6], 0 }
   0x2   :  { %11 = vsyncpa [#allocation4], 0 }
   0x3   :  { %13 = vsyncpa [#allocation4 + $0x1], 0  ;;  %s1458_s15 = smov 0   ;;  %s1460_s16 = smov 0  }
   0x4   :  { %s1462_s17 = smov 0   ;;  %s1464_s18 = smov 0  }
   0x5 LB: > { %s1479_s19 = sadd.s32 4294967295, %s1425_s18   ;;  %s1176_s20 = sadd.s32 4294967294, %s1425_s18   ;;  %s1425_s18 = sphi %s1464_s18, %s1860_s18   ;;  %s1421_s17 = sphi %s1462_s17, %s1859_s17   ;;  %s1417_s16 = sphi %s1460_s16, %s1858_s16   ;;  %s1413_s15 = sphi %s1458_s15, %s1857_s15  }
   0x6   : > { %s1483_s21 = sadd.s32 1, %s1425_s18   ;;  %s115_s22 = sadd.s32 1, %s1421_s17 }
   0x7   : > { %s112_s23 = ssub.s32 %s1425_s18, %s1483_s21  ;;  %p125_p0 = scmp.ne.s32.totalorder %s1421_s17, %s1417_s16 }
   0x8   : > { %p113_p1 = scmp.eq.s32.totalorder %s112_s23, 0  ;;  %p126_p2 = scmp.eq.s32.totalorder %s1479_s19, 1 }
   0x9   : > { %p131_p3 = scmp.ne.s32.totalorder %s1417_s16, %s1413_s15  ;;  %p132_p4 = scmp.eq.s32.totalorder %s1176_s20, 1 }
   0xa   : > { %s1494_s24 = scalar_select %p113_p1, %s1421_s17, %s115_s22  }
   0xb   : > { %p1496_p5 = por %p126_p2, %p125_p0  ;;  %p1500_p6 = por %p132_p4, %p131_p3 }
   0xc   : > { %p1177_p7 = scmp.ge.s32.totalorder %s1425_s18, 1  ;;  %p139_p8 = scmp.lt.s32.totalorder %s1425_s18, 3 }
   0xd   : > { %p1220_p9 = scmp.eq.s32.totalorder %s1479_s19, 0  ;;  %s150_s30 = sshll.u32 %s1836_s1, 4  ;;  %s151_s30 = int_to_ptr.hbm [resolvable:$true] %s150_s30 }
   0xe   : > { %p1507_p10 = pnand %p1177_p7, %p139_p8  ;;  %s1427_s5 = smov [#allocation2]  }
   0xf   : > { %s152_s6 = sshll.u32 %s1427_s5, 4  ;;  %s167_s9 = sshll.u32 %s1838_s3, 4  ;;  %s153_s6 = int_to_ptr.vmem [resolvable:$true] %s152_s6  ;;  %s168_s9 = int_to_ptr.hbm [resolvable:$true] %s167_s9 }
  0x10   : > { %p1209_p11 = pneg %p1507_p10  ;;  %s1428_s10 = smov 512  }
  0x11   : > { %s1429_s11 = smov 32   ;;  %s1430_s12 = smov [#allocation5]  }
  0x12   : > { %p1210_p12 = pnand %p1220_p9, %p1209_p11  ;;  %s169_s13 = sshll.u32 %s1430_s12, 4  ;;  %s170_s13 = int_to_ptr.vmem [resolvable:$true] %s169_s13 }
  0x13   : > { %s1431_s14 = smov 128   ;;  %s1432_s20 = smov 8  }
  0x14   : > { %1212 = dma.hbm_to_vmem [thread:$0]  (!%p1210_p12), %s151_s30, 24576, %s153_s6, [#allocation3], %s1428_s10, %s1428_s10, %s1429_s11  }
  0x15   : > { %1215 = dma.hbm_to_vmem [thread:$0]  (!%p1210_p12), %s168_s9, 8192, %s170_s13, [#allocation6], %s1431_s14, %s1431_s14, %s1432_s20  }
  0x16   : > { %193 = sbr.rel (%p1507_p10) target bundleno = 468 (0x1d4), region = 36 }
  0x1b   : > { %1400 = dma.done.wait (%p1220_p9), [#allocation3], 24576  }
  0x1c   : > { %1402 = vsyncadd (%p1220_p9), [#allocation3], 4294942720 }
  0x1d   : > { %1404 = dma.done.wait (%p1220_p9), [#allocation6], 8192  }
  0x1e   : > { %1406 = vsyncadd (%p1220_p9), [#allocation6], 4294959104  ;;  %v363_v0 = vld [vmem:[#allocation2 + $0x3e0] sm:$0xff]  ;;  %v364_v1 = vld [vmem:[#allocation2 + $0x3e8] sm:$0xff]  ;;  %p224_p13 = scmp.lt.s32.totalorder %s1479_s19, 1  ;;  %vm370_vm0 = vcmask 1046528   ;;  %s1095_s9 = scalar_lea.hbm %s1839_s4, %s1479_s19 }
  0x1f   : > { %v365_v2 = vld [vmem:[#allocation2 + $0x3f0] sm:$0xff]  ;;  %378 = vmatpush.msra.mxu0 %v363_v0  ;;  %401 = vmatpush.msra.mxu1 %v364_v1  ;;  %v366_v3 = vld [vmem:[#allocation2 + $0x3f8] sm:$0xff]  ;;  %v359_v4 = vld [vmem:[#allocation2 + $0x3c0] sm:$0xff]  ;;  %vm627_vm1 = vcmask 1045504   ;;  %s222_s6 = sand.u32 1, %s1417_s16   ;;  %s1099_s12 = sshll.u32 %s1095_s9, 4  ;;  %s1100_s12 = int_to_ptr.hbm [resolvable:$true] %s1099_s12 }
  0x20   : > { %v360_v5 = vld [vmem:[#allocation2 + $0x3c8] sm:$0xff]  ;;  %424 = vmatpush.msra.mxu2 %v365_v2  ;;  %447 = vmatpush.msra.mxu3 %v366_v3  ;;  %v361_v6 = vld [vmem:[#allocation2 + $0x3d0] sm:$0xff]  ;;  %v362_v7 = vld [vmem:[#allocation2 + $0x3d8] sm:$0xff]  ;;  %s1535_s22 = scalar_select %p224_p13, %s1479_s19, 1 }
  0x21   : > { %v355_v8 = vld [vmem:[#allocation2 + $0x3a0] sm:$0xff]  ;;  %379 = vmatpush.msra.mxu0 %v359_v4  ;;  %402 = vmatpush.msra.mxu1 %v360_v5  ;;  %v356_v9 = vld [vmem:[#allocation2 + $0x3a8] sm:$0xff]  ;;  %v357_v10 = vld [vmem:[#allocation2 + $0x3b0] sm:$0xff]  ;;  %s223_s10 = scalar_lea.vmem [#allocation7], %s222_s6  ;;  %s1087_s13 = scalar_lea.sflag [#allocation4], %s222_s6 }
  0x22   : > { %v358_v11 = vld [vmem:[#allocation2 + $0x3b8] sm:$0xff]  ;;  %425 = vmatpush.msra.mxu2 %v361_v6  ;;  %448 = vmatpush.msra.mxu3 %v362_v7  ;;  %v351_v12 = vld [vmem:[#allocation2 + $0x380] sm:$0xff]  ;;  %v352_v13 = vld [vmem:[#allocation2 + $0x388] sm:$0xff]  ;;  %s1198_s23 = smul.u32 24, %s1535_s22  ;;  %s1097_s11 = sshll.u32 %s223_s10, 4  ;;  %s1098_s11 = int_to_ptr.vmem [resolvable:$true] %s1097_s11 }
  0x23   : > { %380 = vmatpush.msra.mxu0 %v355_v8  ;;  %403 = vmatpush.msra.mxu1 %v356_v9  ;;  %v353_v14 = vld [vmem:[#allocation2 + $0x390] sm:$0xff]  ;;  %v354_v15 = vld [vmem:[#allocation2 + $0x398] sm:$0xff]  ;;  %v347_v16 = vld [vmem:[#allocation2 + $0x360] sm:$0xff]  ;;  %s1369_s14 = sshra.s32 %s1100_s12, 4  ;;  %s1375_s19 = scalar_lea.hbm %s1839_s4, 2  ;;  %s1370_s14 = int_to_ptr.hbm [resolvable:$true] %s1369_s14 }
  0x24   : > { %426 = vmatpush.msra.mxu2 %v357_v10  ;;  %449 = vmatpush.msra.mxu3 %v358_v11  ;;  %v348_v17 = vld [vmem:[#allocation2 + $0x368] sm:$0xff]  ;;  %v349_v18 = vld [vmem:[#allocation2 + $0x370] sm:$0xff]  ;;  %v350_v19 = vld [vmem:[#allocation2 + $0x378] sm:$0xff]  ;;  %s1541_s29 = scalar_lea.vmem %s1835_s0, %s1198_s23  ;;  %s1371_s20 = scalar_lea.hbm %s1370_s14, 1 }
  0x25   : > { %381 = vmatpush.msra.mxu0 %v351_v12  ;;  %404 = vmatpush.msra.mxu1 %v352_v13  ;;  %v343_v20 = vld [vmem:[#allocation2 + $0x340] sm:$0xff]  ;;  %v344_v21 = vld [vmem:[#allocation2 + $0x348] sm:$0xff]  ;;  %v345_v22 = vld [vmem:[#allocation2 + $0x350] sm:$0xff]  ;;  %p1372_p0 = scmp.ne.s32.totalorder %s1370_s14, %s1371_s20  ;;  %p1376_p3 = scmp.lt.s32.totalorder %s1370_s14, %s1839_s4 }
  0x26   : > { %427 = vmatpush.msra.mxu2 %v353_v14  ;;  %450 = vmatpush.msra.mxu3 %v354_v15  ;;  %v346_v23 = vld [vmem:[#allocation2 + $0x358] sm:$0xff]  ;;  %v339_v24 = vld [vmem:[#allocation2 + $0x320] sm:$0xff]  ;;  %v340_v25 = vld [vmem:[#allocation2 + $0x328] sm:$0xff]  ;;  %p1377_p4 = scmp.lt.s32.totalorder %s1375_s19, %s1371_s20 }
  0x27   : > { %382 = vmatpush.msra.mxu0 %v347_v16  ;;  %405 = vmatpush.msra.mxu1 %v348_v17  ;;  %v341_v26 = vld [vmem:[#allocation2 + $0x330] sm:$0xff]  ;;  %v342_v27 = vld [vmem:[#allocation2 + $0x338] sm:$0xff]  ;;  %v335_v28 = vld [vmem:[#allocation2 + $0x300] sm:$0xff]  ;;  %p1373_p1 = pnand %p1372_p0, %p1496_p5 }
  0x28   : > { %428 = vmatpush.msra.mxu2 %v349_v18  ;;  %451 = vmatpush.msra.mxu3 %v350_v19  ;;  %v336_v29 = vld [vmem:[#allocation2 + $0x308] sm:$0xff]  ;;  %v337_v30 = vld [vmem:[#allocation2 + $0x310] sm:$0xff]  ;;  %v338_v31 = vld [vmem:[#allocation2 + $0x318] sm:$0xff]  ;;  %p1378_p7 = por %p1377_p4, %p1376_p3 }
  0x29   : > { %383 = vmatpush.msra.mxu0 %v343_v20  ;;  %406 = vmatpush.msra.mxu1 %v344_v21  ;;  %v331_v32 = vld [vmem:[#allocation2 + $0x2e0] sm:$0xff]  ;;  %v332_v33 = vld [vmem:[#allocation2 + $0x2e8] sm:$0xff]  ;;  %v333_v34 = vld [vmem:[#allocation2 + $0x2f0] sm:$0xff]  ;;  %p1374_p2 = pneg %p1373_p1 }
  0x2a   : > { %429 = vmatpush.msra.mxu2 %v345_v22  ;;  %452 = vmatpush.msra.mxu3 %v346_v23  ;;  %v334_v35 = vld [vmem:[#allocation2 + $0x2f8] sm:$0xff]  ;;  %v327_v36 = vld [vmem:[#allocation2 + $0x2c0] sm:$0xff]  ;;  %v328_v37 = vld [vmem:[#allocation2 + $0x2c8] sm:$0xff] }
  0x2b   : > { %384 = vmatpush.msra.mxu0 %v339_v24  ;;  %407 = vmatpush.msra.mxu1 %v340_v25  ;;  %v329_v38 = vld [vmem:[#allocation2 + $0x2d0] sm:$0xff]  ;;  %v330_v39 = vld [vmem:[#allocation2 + $0x2d8] sm:$0xff]  ;;  %v323_v40 = vld [vmem:[#allocation2 + $0x2a0] sm:$0xff]  ;;  %p1379_p8 = pnand %p1378_p7, %p1374_p2 }
  0x2c   : > { %430 = vmatpush.msra.mxu2 %v341_v26  ;;  %453 = vmatpush.msra.mxu3 %v342_v27  ;;  %v324_v41 = vld [vmem:[#allocation2 + $0x2a8] sm:$0xff]  ;;  %v325_v42 = vld [vmem:[#allocation2 + $0x2b0] sm:$0xff]  ;;  %v326_v43 = vld [vmem:[#allocation2 + $0x2b8] sm:$0xff] }
  0x2d   : > { %385 = vmatpush.msra.mxu0 %v335_v28  ;;  %408 = vmatpush.msra.mxu1 %v336_v29  ;;  %v319_v44 = vld [vmem:[#allocation2 + $0x280] sm:$0xff]  ;;  %v320_v45 = vld [vmem:[#allocation2 + $0x288] sm:$0xff]  ;;  %v321_v46 = vld [vmem:[#allocation2 + $0x290] sm:$0xff] }
  0x2e   : > { %431 = vmatpush.msra.mxu2 %v337_v30  ;;  %454 = vmatpush.msra.mxu3 %v338_v31  ;;  %v322_v47 = vld [vmem:[#allocation2 + $0x298] sm:$0xff]  ;;  %v315_v48 = vld [vmem:[#allocation2 + $0x260] sm:$0xff]  ;;  %v316_v49 = vld [vmem:[#allocation2 + $0x268] sm:$0xff] }
  0x2f   : > { %386 = vmatpush.msra.mxu0 %v331_v32  ;;  %409 = vmatpush.msra.mxu1 %v332_v33  ;;  %v317_v50 = vld [vmem:[#allocation2 + $0x270] sm:$0xff]  ;;  %v318_v51 = vld [vmem:[#allocation2 + $0x278] sm:$0xff]  ;;  %v311_v52 = vld [vmem:[#allocation2 + $0x240] sm:$0xff] }
  0x30   : > { %432 = vmatpush.msra.mxu2 %v333_v34  ;;  %455 = vmatpush.msra.mxu3 %v334_v35  ;;  %v312_v53 = vld [vmem:[#allocation2 + $0x248] sm:$0xff]  ;;  %v313_v54 = vld [vmem:[#allocation2 + $0x250] sm:$0xff]  ;;  %v314_v55 = vld [vmem:[#allocation2 + $0x258] sm:$0xff] }
  0x31   : > { %387 = vmatpush.msra.mxu0 %v327_v36  ;;  %410 = vmatpush.msra.mxu1 %v328_v37  ;;  %v307_v56 = vld [vmem:[#allocation2 + $0x220] sm:$0xff]  ;;  %v308_v57 = vld [vmem:[#allocation2 + $0x228] sm:$0xff]  ;;  %v309_v58 = vld [vmem:[#allocation2 + $0x230] sm:$0xff] }
  0x32   : > { %433 = vmatpush.msra.mxu2 %v329_v38  ;;  %456 = vmatpush.msra.mxu3 %v330_v39  ;;  %v310_v59 = vld [vmem:[#allocation2 + $0x238] sm:$0xff]  ;;  %v303_v60 = vld [vmem:[#allocation2 + $0x200] sm:$0xff]  ;;  %v304_v61 = vld [vmem:[#allocation2 + $0x208] sm:$0xff] }
  0x33   : > { %388 = vmatpush.msra.mxu0 %v323_v40  ;;  %411 = vmatpush.msra.mxu1 %v324_v41  ;;  %v305_v62 = vld [vmem:[#allocation2 + $0x210] sm:$0xff]  ;;  %v306_v63 = vld [vmem:[#allocation2 + $0x218] sm:$0xff]  ;;  %v298_v0 = vld [vmem:[#allocation2 + $0x1e0] sm:$0xff] }
  0x34   : > { %434 = vmatpush.msra.mxu2 %v325_v42  ;;  %457 = vmatpush.msra.mxu3 %v326_v43  ;;  %v299_v1 = vld [vmem:[#allocation2 + $0x1e8] sm:$0xff]  ;;  %v300_v2 = vld [vmem:[#allocation2 + $0x1f0] sm:$0xff]  ;;  %v301_v3 = vld [vmem:[#allocation2 + $0x1f8] sm:$0xff] }
  0x35   : > { %389 = vmatpush.msra.mxu0 %v319_v44  ;;  %412 = vmatpush.msra.mxu1 %v320_v45  ;;  %v294_v4 = vld [vmem:[#allocation2 + $0x1c0] sm:$0xff]  ;;  %v295_v5 = vld [vmem:[#allocation2 + $0x1c8] sm:$0xff]  ;;  %v296_v8 = vld [vmem:[#allocation2 + $0x1d0] sm:$0xff] }
  0x36   : > { %435 = vmatpush.msra.mxu2 %v321_v46  ;;  %458 = vmatpush.msra.mxu3 %v322_v47  ;;  %v229_v6 = vld [vmem:[%s1541_s29] sm:$0xff]  ;;  %v230_v7 = vld [vmem:[%s1541_s29 + $0x8] sm:$0xff]  ;;  %v297_v9 = vld [vmem:[#allocation2 + $0x1d8] sm:$0xff] }
  0x37   : > { %390 = vmatpush.msra.mxu0 %v315_v48  ;;  %413 = vmatpush.msra.mxu1 %v316_v49  ;;  %v290_v10 = vld [vmem:[#allocation2 + $0x1a0] sm:$0xff]  ;;  %v291_v11 = vld [vmem:[#allocation2 + $0x1a8] sm:$0xff]  ;;  %v1185_v12 = vadd.f32 -0.5, %v229_v6  ;;  %v1186_v13 = vadd.f32 -0.5, %v230_v7  ;;  %v292_v14 = vld [vmem:[#allocation2 + $0x1b0] sm:$0xff] }
  0x38   : > { %436 = vmatpush.msra.mxu2 %v317_v50  ;;  %459 = vmatpush.msra.mxu3 %v318_v51  ;;  %v293_v15 = vld [vmem:[#allocation2 + $0x1b8] sm:$0xff]  ;;  %v286_v16 = vld [vmem:[#allocation2 + $0x180] sm:$0xff]  ;;  %v287_v17 = vld [vmem:[#allocation2 + $0x188] sm:$0xff] }
  0x39   : > { %391 = vmatpush.msra.mxu0 %v311_v52  ;;  %414 = vmatpush.msra.mxu1 %v312_v53  ;;  %v288_v18 = vld [vmem:[#allocation2 + $0x190] sm:$0xff]  ;;  %v289_v19 = vld [vmem:[#allocation2 + $0x198] sm:$0xff]  ;;  %v282_v20 = vld [vmem:[#allocation2 + $0x160] sm:$0xff]  ;;  %v1545_v22 = vmul.f32 2.0, %v1185_v12  ;;  %v1547_v23 = vmul.f32 2.0, %v1186_v13 }
  0x3a   : > { %437 = vmatpush.msra.mxu2 %v313_v54  ;;  %460 = vmatpush.msra.mxu3 %v314_v55  ;;  %v283_v21 = vld [vmem:[#allocation2 + $0x168] sm:$0xff]  ;;  %v284_v24 = vld [vmem:[#allocation2 + $0x170] sm:$0xff]  ;;  %v285_v25 = vld [vmem:[#allocation2 + $0x178] sm:$0xff] }
  0x3b   : > { %392 = vmatpush.msra.mxu0 %v307_v56  ;;  %415 = vmatpush.msra.mxu1 %v308_v57  ;;  %v278_v26 = vld [vmem:[#allocation2 + $0x140] sm:$0xff]  ;;  %v279_v27 = vld [vmem:[#allocation2 + $0x148] sm:$0xff]  ;;  %v231_v28 = vld [vmem:[%s1541_s29 + $0x10] sm:$0x3]  ;;  %v371_v33 = vrot.slane %v1545_v22, 1  ;;  %v372_v34 = vrot.slane %v1547_v23, 1 }
  0x3c   : > { %438 = vmatpush.msra.mxu2 %v309_v58  ;;  %461 = vmatpush.msra.mxu3 %v310_v59  ;;  %v280_v29 = vld [vmem:[#allocation2 + $0x150] sm:$0xff]  ;;  %v281_v30 = vld [vmem:[#allocation2 + $0x158] sm:$0xff]  ;;  %v274_v31 = vld [vmem:[#allocation2 + $0x120] sm:$0xff]  ;;  %v1187_v37 = vadd.f32 -0.5, %v231_v28 }
  0x3d   : > { %393 = vmatpush.msra.mxu0 %v303_v60  ;;  %416 = vmatpush.msra.mxu1 %v304_v61  ;;  %v275_v32 = vld [vmem:[#allocation2 + $0x128] sm:$0xff]  ;;  %v276_v35 = vld [vmem:[#allocation2 + $0x130] sm:$0xff]  ;;  %v277_v36 = vld [vmem:[#allocation2 + $0x138] sm:$0xff]  ;;  %v373_v42 = vsel %vm370_vm0, %v371_v33, %v372_v34 }
  0x3e   : > { %439 = vmatpush.msra.mxu2 %v305_v62  ;;  %462 = vmatpush.msra.mxu3 %v306_v63  ;;  %v270_v38 = vld [vmem:[#allocation2 + $0x100] sm:$0xff]  ;;  %v271_v39 = vld [vmem:[#allocation2 + $0x108] sm:$0xff]  ;;  %v272_v40 = vld [vmem:[#allocation2 + $0x110] sm:$0xff]  ;;  %v1553_v45 = vmul.f32 2.0, %v1187_v37 }
  0x3f   : > { %470 = vmatpush.msrb.mxu0 %v298_v0  ;;  %493 = vmatpush.msrb.mxu1 %v299_v1  ;;  %v273_v41 = vld [vmem:[#allocation2 + $0x118] sm:$0xff]  ;;  %v266_v43 = vld [vmem:[#allocation2 + $0xe0] sm:$0xff]  ;;  %v267_v44 = vld [vmem:[#allocation2 + $0xe8] sm:$0xff] }
  0x40   : > { %516 = vmatpush.msrb.mxu2 %v300_v2  ;;  %539 = vmatpush.msrb.mxu3 %v301_v3  ;;  %v268_v46 = vld [vmem:[#allocation2 + $0xf0] sm:$0xff]  ;;  %v269_v47 = vld [vmem:[#allocation2 + $0xf8] sm:$0xff]  ;;  %v262_v48 = vld [vmem:[#allocation2 + $0xc0] sm:$0xff]  ;;  %v374_v54 = vrot.slane %v1553_v45, 1 }
  0x41   : > { %471 = vmatpush.msrb.mxu0 %v294_v4  ;;  %494 = vmatpush.msrb.mxu1 %v295_v5  ;;  %v263_v49 = vld [vmem:[#allocation2 + $0xc8] sm:$0xff]  ;;  %v264_v50 = vld [vmem:[#allocation2 + $0xd0] sm:$0xff]  ;;  %v265_v51 = vld [vmem:[#allocation2 + $0xd8] sm:$0xff] }
  0x42   : > { %517 = vmatpush.msrb.mxu2 %v296_v8  ;;  %540 = vmatpush.msrb.mxu3 %v297_v9  ;;  %v258_v52 = vld [vmem:[#allocation2 + $0xa0] sm:$0xff]  ;;  %v259_v53 = vld [vmem:[#allocation2 + $0xa8] sm:$0xff]  ;;  %v260_v55 = vld [vmem:[#allocation2 + $0xb0] sm:$0xff]  ;;  %v375_v61 = vsel %vm370_vm0, %v372_v34, %v374_v54 }
  0x43   : > { %472 = vmatpush.msrb.mxu0 %v290_v10  ;;  %495 = vmatpush.msrb.mxu1 %v291_v11  ;;  %v261_v56 = vld [vmem:[#allocation2 + $0xb8] sm:$0xff]  ;;  %v254_v57 = vld [vmem:[#allocation2 + $0x80] sm:$0xff]  ;;  %v255_v58 = vld [vmem:[#allocation2 + $0x88] sm:$0xff] }
  0x44   : > { %518 = vmatpush.msrb.mxu2 %v292_v14  ;;  %541 = vmatpush.msrb.mxu3 %v293_v15  ;;  %v256_v59 = vld [vmem:[#allocation2 + $0x90] sm:$0xff]  ;;  %v257_v60 = vld [vmem:[#allocation2 + $0x98] sm:$0xff]  ;;  %v250_v62 = vld [vmem:[#allocation2 + $0x60] sm:$0xff] }
  0x45   : > { %473 = vmatpush.msrb.mxu0 %v286_v16  ;;  %496 = vmatpush.msrb.mxu1 %v287_v17  ;;  %v251_v63 = vld [vmem:[#allocation2 + $0x68] sm:$0xff]  ;;  %v252_v0 = vld [vmem:[#allocation2 + $0x70] sm:$0xff]  ;;  %v253_v1 = vld [vmem:[#allocation2 + $0x78] sm:$0xff] }
  0x46   : > { %519 = vmatpush.msrb.mxu2 %v288_v18  ;;  %542 = vmatpush.msrb.mxu3 %v289_v19  ;;  %v246_v2 = vld [vmem:[#allocation2 + $0x40] sm:$0xff]  ;;  %v247_v3 = vld [vmem:[#allocation2 + $0x48] sm:$0xff]  ;;  %v248_v4 = vld [vmem:[#allocation2 + $0x50] sm:$0xff] }
  0x47   : > { %474 = vmatpush.msrb.mxu0 %v282_v20  ;;  %497 = vmatpush.msrb.mxu1 %v283_v21  ;;  %v249_v5 = vld [vmem:[#allocation2 + $0x58] sm:$0xff]  ;;  %v242_v6 = vld [vmem:[#allocation2 + $0x20] sm:$0xff]  ;;  %v243_v7 = vld [vmem:[#allocation2 + $0x28] sm:$0xff] }
  0x48   : > { %520 = vmatpush.msrb.mxu2 %v284_v24  ;;  %543 = vmatpush.msrb.mxu3 %v285_v25  ;;  %v244_v8 = vld [vmem:[#allocation2 + $0x30] sm:$0xff]  ;;  %v245_v9 = vld [vmem:[#allocation2 + $0x38] sm:$0xff]  ;;  %v238_v10 = vld [vmem:[#allocation2] sm:$0xff] }
  0x49   : > { %475 = vmatpush.msrb.mxu0 %v278_v26  ;;  %498 = vmatpush.msrb.mxu1 %v279_v27  ;;  %v239_v11 = vld [vmem:[#allocation2 + $0x8] sm:$0xff]  ;;  %v240_v12 = vld [vmem:[#allocation2 + $0x10] sm:$0xff]  ;;  %v241_v13 = vld [vmem:[#allocation2 + $0x18] sm:$0xff] }
  0x4a   : > { %521 = vmatpush.msrb.mxu2 %v280_v29  ;;  %544 = vmatpush.msrb.mxu3 %v281_v30  ;;  %v623_v14 = vld [vmem:[#allocation2 + $0x5e0] sm:$0xff]  ;;  %v624_v15 = vld [vmem:[#allocation2 + $0x5e8] sm:$0xff]  ;;  %v625_v16 = vld [vmem:[#allocation2 + $0x5f0] sm:$0xff] }
  0x4b   : > { %476 = vmatpush.msrb.mxu0 %v274_v31  ;;  %499 = vmatpush.msrb.mxu1 %v275_v32  ;;  %v626_v17 = vld [vmem:[#allocation2 + $0x5f8] sm:$0xff]  ;;  %v619_v18 = vld [vmem:[#allocation2 + $0x5c0] sm:$0xff]  ;;  %v620_v19 = vld [vmem:[#allocation2 + $0x5c8] sm:$0xff] }
  0x4c   : > { %522 = vmatpush.msrb.mxu2 %v276_v35  ;;  %545 = vmatpush.msrb.mxu3 %v277_v36  ;;  %v621_v20 = vld [vmem:[#allocation2 + $0x5d0] sm:$0xff]  ;;  %v622_v21 = vld [vmem:[#allocation2 + $0x5d8] sm:$0xff]  ;;  %v615_v24 = vld [vmem:[#allocation2 + $0x5a0] sm:$0xff] }
  0x4d   : > { %477 = vmatpush.msrb.mxu0 %v270_v38  ;;  %500 = vmatpush.msrb.mxu1 %v271_v39  ;;  %v616_v25 = vld [vmem:[#allocation2 + $0x5a8] sm:$0xff]  ;;  %v617_v26 = vld [vmem:[#allocation2 + $0x5b0] sm:$0xff]  ;;  %v618_v27 = vld [vmem:[#allocation2 + $0x5b8] sm:$0xff] }
  0x4e   : > { %523 = vmatpush.msrb.mxu2 %v272_v40  ;;  %546 = vmatpush.msrb.mxu3 %v273_v41  ;;  %v611_v28 = vld [vmem:[#allocation2 + $0x580] sm:$0xff]  ;;  %v612_v29 = vld [vmem:[#allocation2 + $0x588] sm:$0xff]  ;;  %v613_v30 = vld [vmem:[#allocation2 + $0x590] sm:$0xff] }
  0x4f   : > { %440 = vmatmul.f32.vlgmr.msra.gmra.mxu2 %v373_v42  ;;  %463 = vmatmul.f32.vlgmr.msra.gmra.mxu3 %v373_v42  ;;  %v614_v31 = vld [vmem:[#allocation2 + $0x598] sm:$0xff]  ;;  %v607_v32 = vld [vmem:[#allocation2 + $0x560] sm:$0xff]  ;;  %v608_v33 = vld [vmem:[#allocation2 + $0x568] sm:$0xff] }
  0x50   : > { %478 = vmatpush.msrb.mxu0 %v266_v43  ;;  %501 = vmatpush.msrb.mxu1 %v267_v44  ;;  %v609_v34 = vld [vmem:[#allocation2 + $0x570] sm:$0xff]  ;;  %v610_v35 = vld [vmem:[#allocation2 + $0x578] sm:$0xff]  ;;  %v603_v36 = vld [vmem:[#allocation2 + $0x540] sm:$0xff] }
  0x51   : > { %524 = vmatpush.msrb.mxu2 %v268_v46  ;;  %547 = vmatpush.msrb.mxu3 %v269_v47  ;;  %v604_v37 = vld [vmem:[#allocation2 + $0x548] sm:$0xff]  ;;  %v605_v38 = vld [vmem:[#allocation2 + $0x550] sm:$0xff]  ;;  %v606_v39 = vld [vmem:[#allocation2 + $0x558] sm:$0xff] }
  0x52   : > { %479 = vmatpush.msrb.mxu0 %v262_v48  ;;  %502 = vmatpush.msrb.mxu1 %v263_v49  ;;  %v599_v40 = vld [vmem:[#allocation2 + $0x520] sm:$0xff]  ;;  %v600_v41 = vld [vmem:[#allocation2 + $0x528] sm:$0xff]  ;;  %v602_v43 = vld [vmem:[#allocation2 + $0x538] sm:$0xff] }
  0x53   : > { %525 = vmatpush.msrb.mxu2 %v264_v50  ;;  %548 = vmatpush.msrb.mxu3 %v265_v51  ;;  %v595_v44 = vld [vmem:[#allocation2 + $0x500] sm:$0xff]  ;;  %v596_v46 = vld [vmem:[#allocation2 + $0x508] sm:$0xff]  ;;  %v597_v47 = vld [vmem:[#allocation2 + $0x510] sm:$0xff] }
  0x54   : > { %480 = vmatpush.msrb.mxu0 %v258_v52  ;;  %503 = vmatpush.msrb.mxu1 %v259_v53  ;;  %v598_v48 = vld [vmem:[#allocation2 + $0x518] sm:$0xff]  ;;  %v591_v49 = vld [vmem:[#allocation2 + $0x4e0] sm:$0xff]  ;;  %v592_v50 = vld [vmem:[#allocation2 + $0x4e8] sm:$0xff] }
  0x55   : > { %526 = vmatpush.msrb.mxu2 %v260_v55  ;;  %549 = vmatpush.msrb.mxu3 %v261_v56  ;;  %v593_v51 = vld [vmem:[#allocation2 + $0x4f0] sm:$0xff]  ;;  %v594_v52 = vld [vmem:[#allocation2 + $0x4f8] sm:$0xff]  ;;  %v587_v53 = vld [vmem:[#allocation2 + $0x4c0] sm:$0xff] }
  0x56   : > { %481 = vmatpush.msrb.mxu0 %v254_v57  ;;  %504 = vmatpush.msrb.mxu1 %v255_v58  ;;  %v588_v54 = vld [vmem:[#allocation2 + $0x4c8] sm:$0xff]  ;;  %v589_v55 = vld [vmem:[#allocation2 + $0x4d0] sm:$0xff]  ;;  %v590_v56 = vld [vmem:[#allocation2 + $0x4d8] sm:$0xff] }
  0x57   : > { %527 = vmatpush.msrb.mxu2 %v256_v59  ;;  %550 = vmatpush.msrb.mxu3 %v257_v60  ;;  %v583_v57 = vld [vmem:[#allocation2 + $0x4a0] sm:$0xff]  ;;  %v584_v58 = vld [vmem:[#allocation2 + $0x4a8] sm:$0xff]  ;;  %v585_v59 = vld [vmem:[#allocation2 + $0x4b0] sm:$0xff] }
  0x58   : > { %443 = vmatmul.f32.gmra.mxu2 %v375_v61  ;;  %394 = vmatmul.f32.vlgmr.msra.gmra.mxu0 %v373_v42  ;;  %v586_v60 = vld [vmem:[#allocation2 + $0x4b8] sm:$0xff] }
  0x59   : > { %417 = vmatmul.f32.vlgmr.msra.gmra.mxu1 %v373_v42  ;;  %466 = vmatmul.f32.gmra.mxu3 %v375_v61  ;;  %v601_v42 = vld [vmem:[#allocation2 + $0x530] sm:$0xff] }
  0x5a   : > { %482 = vmatpush.msrb.mxu0 %v250_v62  ;;  %505 = vmatpush.msrb.mxu1 %v251_v63  ;;  %v580_v62 = vld [vmem:[#allocation2 + $0x488] sm:$0xff]  ;;  %v581_v63 = vld [vmem:[#allocation2 + $0x490] sm:$0xff] }
  0x5b   : > { %528 = vmatpush.msrb.mxu2 %v252_v0  ;;  %551 = vmatpush.msrb.mxu3 %v253_v1  ;;  %v582_v0 = vld [vmem:[#allocation2 + $0x498] sm:$0xff]  ;;  %v575_v1 = vld [vmem:[#allocation2 + $0x460] sm:$0xff] }
  0x5c   : > { %483 = vmatpush.msrb.mxu0 %v246_v2  ;;  %506 = vmatpush.msrb.mxu1 %v247_v3  ;;  %v576_v2 = vld [vmem:[#allocation2 + $0x468] sm:$0xff]  ;;  %v577_v3 = vld [vmem:[#allocation2 + $0x470] sm:$0xff] }
  0x5d   : > { %529 = vmatpush.msrb.mxu2 %v248_v4  ;;  %552 = vmatpush.msrb.mxu3 %v249_v5  ;;  %v578_v4 = vld [vmem:[#allocation2 + $0x478] sm:$0xff]  ;;  %v571_v5 = vld [vmem:[#allocation2 + $0x440] sm:$0xff] }
  0x5e   : > { %484 = vmatpush.msrb.mxu0 %v242_v6  ;;  %507 = vmatpush.msrb.mxu1 %v243_v7  ;;  %v572_v6 = vld [vmem:[#allocation2 + $0x448] sm:$0xff]  ;;  %v573_v7 = vld [vmem:[#allocation2 + $0x450] sm:$0xff] }
  0x5f   : > { %530 = vmatpush.msrb.mxu2 %v244_v8  ;;  %553 = vmatpush.msrb.mxu3 %v245_v9  ;;  %v574_v8 = vld [vmem:[#allocation2 + $0x458] sm:$0xff]  ;;  %v567_v9 = vld [vmem:[#allocation2 + $0x420] sm:$0xff] }
  0x60   : > { %485 = vmatpush.msrb.mxu0 %v238_v10  ;;  %508 = vmatpush.msrb.mxu1 %v239_v11  ;;  %v568_v10 = vld [vmem:[#allocation2 + $0x428] sm:$0xff]  ;;  %v628_v11 = vrot.slane %v1545_v22, 2 }
  0x61   : > { %531 = vmatpush.msrb.mxu2 %v240_v12  ;;  %554 = vmatpush.msrb.mxu3 %v241_v13  ;;  %v629_v12 = vrot.slane %v1547_v23, 2  ;;  %v569_v13 = vld [vmem:[#allocation2 + $0x430] sm:$0xff] }
  0x62   : > { %532 = vmatmul.f32.vlgmr.msrb.gmra.mxu2 %v1545_v22  ;;  %635 = vmatpush.msra.mxu0 %v623_v14  ;;  %v570_v14 = vld [vmem:[#allocation2 + $0x438] sm:$0xff] }
  0x63   : > { %658 = vmatpush.msra.mxu1 %v624_v15  ;;  %681 = vmatpush.msra.mxu2 %v625_v16  ;;  %v563_v15 = vld [vmem:[#allocation2 + $0x400] sm:$0xff]  ;;  %v564_v16 = vld [vmem:[#allocation2 + $0x408] sm:$0xff] }
  0x64   : > { %704 = vmatpush.msra.mxu3 %v626_v17  ;;  %397 = vmatmul.f32.gmra.mxu0 %v375_v61  ;;  %v565_v17 = vld [vmem:[#allocation2 + $0x410] sm:$0xff] }
  0x65   : > { %420 = vmatmul.f32.gmra.mxu1 %v375_v61  ;;  %555 = vmatmul.f32.vlgmr.msrb.gmra.mxu3 %v1545_v22  ;;  %v579_v61 = vld [vmem:[#allocation2 + $0x480] sm:$0xff] }
  0x66   : > { %636 = vmatpush.msra.mxu0 %v619_v18  ;;  %659 = vmatpush.msra.mxu1 %v620_v19  ;;  %v566_v18 = vld [vmem:[#allocation2 + $0x418] sm:$0xff]  ;;  %v630_v19 = vsel %vm627_vm1, %v628_v11, %v629_v12 }
  0x67   : > { %682 = vmatpush.msra.mxu2 %v621_v20  ;;  %705 = vmatpush.msra.mxu3 %v622_v21 }
  0x68   : > { %637 = vmatpush.msra.mxu0 %v615_v24  ;;  %660 = vmatpush.msra.mxu1 %v616_v25 }
  0x69   : > { %683 = vmatpush.msra.mxu2 %v617_v26  ;;  %706 = vmatpush.msra.mxu3 %v618_v27 }
  0x6a   : > { %638 = vmatpush.msra.mxu0 %v611_v28  ;;  %661 = vmatpush.msra.mxu1 %v612_v29 }
  0x6b   : > { %684 = vmatpush.msra.mxu2 %v613_v30  ;;  %707 = vmatpush.msra.mxu3 %v614_v31 }
  0x6c   : > { %535 = vmatmul.f32.gmra.mxu2 %v1547_v23  ;;  %639 = vmatpush.msra.mxu0 %v607_v32 }
  0x6d   : > { %662 = vmatpush.msra.mxu1 %v608_v33  ;;  %685 = vmatpush.msra.mxu2 %v609_v34 }
  0x6e   : > { %708 = vmatpush.msra.mxu3 %v610_v35  ;;  %486 = vmatmul.f32.vlgmr.msrb.gmra.mxu0 %v1545_v22  ;;  %v1577_v35 = vld [vmem:[%s1837_s2] sm:$0xf] }
  0x6f   : > { %509 = vmatmul.f32.vlgmr.msrb.gmra.mxu1 %v1545_v22  ;;  %558 = vmatmul.f32.gmra.mxu3 %v1547_v23  ;;  %v631_v22 = vrot.slane %v1553_v45, 2 }
  0x70   : > { %640 = vmatpush.msra.mxu0 %v603_v36  ;;  %663 = vmatpush.msra.mxu1 %v604_v37 }
  0x71   : > { %686 = vmatpush.msra.mxu2 %v605_v38  ;;  %709 = vmatpush.msra.mxu3 %v606_v39 }
  0x72   : > { %641 = vmatpush.msra.mxu0 %v599_v40  ;;  %664 = vmatpush.msra.mxu1 %v600_v41  ;;  %v737_v40 = vperm.slane %v1577_v35, 0  ;;  %v738_v41 = vperm.slane %v1577_v35, 1 }
  0x73   : > { %687 = vmatpush.msra.mxu2 %v601_v42  ;;  %710 = vmatpush.msra.mxu3 %v602_v43 }
  0x74   : > { %642 = vmatpush.msra.mxu0 %v595_v44  ;;  %665 = vmatpush.msra.mxu1 %v596_v46 }
  0x75   : > { %688 = vmatpush.msra.mxu2 %v597_v47  ;;  %711 = vmatpush.msra.mxu3 %v598_v48 }
  0x76   : > { %643 = vmatpush.msra.mxu0 %v591_v49  ;;  %666 = vmatpush.msra.mxu1 %v592_v50 }
  0x77   : > { %689 = vmatpush.msra.mxu2 %v593_v51  ;;  %712 = vmatpush.msra.mxu3 %v594_v52 }
  0x78   : > { %489 = vmatmul.f32.gmra.mxu0 %v1547_v23  ;;  %512 = vmatmul.f32.gmra.mxu1 %v1547_v23  ;;  %v632_v23 = vsel %vm627_vm1, %v629_v12, %v631_v22  ;;  %v954_v12 = vld [vmem:[#allocation5 + $0x68] sm:$0xff]  ;;  %v953_v22 = vld [vmem:[#allocation5 + $0x60] sm:$0xff] }
  0x79   : > { %644 = vmatpush.msra.mxu0 %v587_v53  ;;  %667 = vmatpush.msra.mxu1 %v588_v54  ;;  %v739_v53 = vperm.slane %v1577_v35, 2  ;;  %v740_v54 = vperm.slane %v1577_v35, 3  ;;  %v946_v35 = vld [vmem:[#allocation5 + $0x28] sm:$0xff] }
  0x7a   : > { %690 = vmatpush.msra.mxu2 %v589_v55  ;;  %713 = vmatpush.msra.mxu3 %v590_v56 }
  0x7b   : > { %645 = vmatpush.msra.mxu0 %v583_v57  ;;  %668 = vmatpush.msra.mxu1 %v584_v58 }
  0x7c   : > { %691 = vmatpush.msra.mxu2 %v585_v59  ;;  %714 = vmatpush.msra.mxu3 %v586_v60 }
  0x7d   : > { %646 = vmatpush.msra.mxu0 %v579_v61  ;;  %669 = vmatpush.msra.mxu1 %v580_v62 }
  0x7e   : > { %692 = vmatpush.msra.mxu2 %v581_v63  ;;  %715 = vmatpush.msra.mxu3 %v582_v0 }
  0x7f   : > { %647 = vmatpush.msra.mxu0 %v575_v1  ;;  %670 = vmatpush.msra.mxu1 %v576_v2  ;;  %v956_v1 = vld [vmem:[#allocation5 + $0x78] sm:$0xff] }
  0x80   : > { %693 = vmatpush.msra.mxu2 %v577_v3  ;;  %716 = vmatpush.msra.mxu3 %v578_v4  ;;  %v972_v2 = vld [vmem:[#allocation5 + $0xf8] sm:$0xff] }
  0x81   : > { %648 = vmatpush.msra.mxu0 %v571_v5  ;;  %671 = vmatpush.msra.mxu1 %v572_v6 }
  0x82   : > { %694 = vmatpush.msra.mxu2 %v573_v7  ;;  %717 = vmatpush.msra.mxu3 %v574_v8  ;;  %v955_v7 = vld [vmem:[#allocation5 + $0x70] sm:$0xff] }
  0x83   : > { %649 = vmatpush.msra.mxu0 %v567_v9  ;;  %672 = vmatpush.msra.mxu1 %v568_v10  ;;  %v971_v8 = vld [vmem:[#allocation5 + $0xf0] sm:$0xff] }
  0x84   : > { %695 = vmatpush.msra.mxu2 %v569_v13  ;;  %718 = vmatpush.msra.mxu3 %v570_v14  ;;  %v970_v13 = vld [vmem:[#allocation5 + $0xe8] sm:$0xff] }
  0x85   : > { %650 = vmatpush.msra.mxu0 %v563_v15  ;;  %673 = vmatpush.msra.mxu1 %v564_v16 }
  0x86   : > { %696 = vmatpush.msra.mxu2 %v565_v17  ;;  %719 = vmatpush.msra.mxu3 %v566_v18 }
  0x87   : > { %651 = vmatmul.f32.vlgmr.msra.gmra.mxu0 %v630_v19  ;;  %674 = vmatmul.f32.vlgmr.msra.gmra.mxu1 %v630_v19 }
  0x88   : > { %697 = vmatmul.f32.vlgmr.msra.gmra.mxu2 %v630_v19  ;;  %720 = vmatmul.f32.vlgmr.msra.gmra.mxu3 %v630_v19 }
  0x89   : > { %1005 = vmatpush.msrb.mxu0 %v956_v1  ;;  %1025 = vmatpush.msrb.mxu1 %v972_v2  ;;  %v983_v1 = vld [vmem:[#allocation5 + $0x150] sm:$0xff] }
  0x8a   : > { %v999_v2 = vld [vmem:[#allocation5 + $0x1d0] sm:$0xff] }
  0x8b   : > { %1006 = vmatpush.msrb.mxu0 %v955_v7  ;;  %1026 = vmatpush.msrb.mxu1 %v971_v8 }
  0x8d   : > { %1007 = vmatpush.msrb.mxu0 %v954_v12  ;;  %1027 = vmatpush.msrb.mxu1 %v970_v13  ;;  %v982_v12 = vld [vmem:[#allocation5 + $0x148] sm:$0xff] }
  0x8e   : > { %v998_v13 = vld [vmem:[#allocation5 + $0x1c8] sm:$0xff] }
  0x8f   : > { %654 = vmatmul.f32.gmra.mxu0 %v632_v23  ;;  %677 = vmatmul.f32.gmra.mxu1 %v632_v23 }
  0x90   : > { %700 = vmatmul.f32.gmra.mxu2 %v632_v23  ;;  %723 = vmatmul.f32.gmra.mxu3 %v632_v23  ;;  %v969_v23 = vld [vmem:[#allocation5 + $0xe0] sm:$0xff] }
  0x91   : > { %1008 = vmatpush.msrb.mxu0 %v953_v22  ;;  %1028 = vmatpush.msrb.mxu1 %v969_v23  ;;  %v997_v23 = vld [vmem:[#allocation5 + $0x1c0] sm:$0xff] }
  0xd2   : > { %v441_v24 = vpop.f32.mrf.mxu2  ;;  %v464_v25 = vpop.f32.mrf.mxu3 }
  0xd5   : > { %v395_v20 = vpop.f32.mrf.mxu0 }
  0xd6   : > { %v418_v21 = vpop.f32.mrf.mxu1 }
  0xdb   : > { %v1570_v28 = vpop.f32.mrf.mxu2 }
  0xdc   : > { %v1572_v29 = vpop.f32.mrf.mxu3 }
  0xe1   : > { %v398_v26 = vpop.f32.mrf.mxu0 }
  0xe2   : > { %v421_v27 = vpop.f32.mrf.mxu1 }
  0xe5   : > { %v533_v32 = vpop.f32.mrf.mxu2 }
  0xe6   : > { %v534_v51 = vadd.f32 %v533_v32, %v441_v24  ;;  %v1004_v24 = vld [vmem:[#allocation5 + $0x1f8] sm:$0xff]  ;;  %v967_v32 = vld [vmem:[#allocation5 + $0xd0] sm:$0xff] }
  0xe7   : > { %1065 = vmatpush.msrb.mxu3 %v1004_v24 }
  0xe8   : > { %v556_v45 = vpop.f32.mrf.mxu3 }
  0xe9   : > { %v557_v52 = vadd.f32 %v556_v45, %v464_v25  ;;  %v952_v25 = vld [vmem:[#allocation5 + $0x58] sm:$0xff]  ;;  %v986_v45 = vld [vmem:[#allocation5 + $0x168] sm:$0xff] }
  0xea   : > { %1009 = vmatpush.msrb.mxu0 %v952_v25  ;;  %v945_v25 = vld [vmem:[#allocation5 + $0x20] sm:$0xff] }
  0xeb   : > { %v487_v30 = vpop.f32.mrf.mxu0 }
  0xec   : > { %v510_v31 = vpop.f32.mrf.mxu1  ;;  %v488_v36 = vadd.f32 %v487_v30, %v395_v20  ;;  %v988_v20 = vld [vmem:[#allocation5 + $0x178] sm:$0xff] }
  0xed   : > { %v511_v37 = vadd.f32 %v510_v31, %v418_v21  ;;  %1045 = vmatpush.msrb.mxu2 %v988_v20  ;;  %v1003_v31 = vld [vmem:[#allocation5 + $0x1f0] sm:$0xff] }
  0xee   : > { %1066 = vmatpush.msrb.mxu3 %v1003_v31  ;;  %v980_v31 = vld [vmem:[#allocation5 + $0x138] sm:$0xff] }
  0xef   : > { %v536_v38 = vpop.f32.mrf.mxu2 }
  0xf0   : > { %v537_v21 = vadd.f32 %v536_v38, %v1570_v28  ;;  %v951_v28 = vld [vmem:[#allocation5 + $0x50] sm:$0xff] }
  0xf1   : > { %1010 = vmatpush.msrb.mxu0 %v951_v28  ;;  %v996_v28 = vld [vmem:[#allocation5 + $0x1b8] sm:$0xff] }
  0xf2   : > { %v1579_v39 = vpop.f32.mrf.mxu3 }
  0xf5   : > { %v490_v33 = vpop.f32.mrf.mxu0  ;;  %v513_v34 = vpop.f32.mrf.mxu1 }
  0xf6   : > { %v491_v55 = vadd.f32 %v490_v33, %v398_v26  ;;  %v514_v56 = vadd.f32 %v513_v34, %v421_v27  ;;  %v968_v26 = vld [vmem:[#allocation5 + $0xd8] sm:$0xff]  ;;  %v987_v27 = vld [vmem:[#allocation5 + $0x170] sm:$0xff] }
  0xf7   : > { %1029 = vmatpush.msrb.mxu1 %v968_v26  ;;  %1046 = vmatpush.msrb.mxu2 %v987_v27  ;;  %v961_v26 = vld [vmem:[#allocation5 + $0xa0] sm:$0xff] }
  0xf9   : > { %1030 = vmatpush.msrb.mxu1 %v967_v32  ;;  %1047 = vmatpush.msrb.mxu2 %v986_v45 }
 0x104   : > { %v652_v42 = vpop.f32.mrf.mxu0  ;;  %v675_v43 = vpop.f32.mrf.mxu1 }
 0x105   : > { %v727_v44 = vadd.f32 %v652_v42, %v488_v36  ;;  %v728_v46 = vadd.f32 %v675_v43, %v511_v37  ;;  %v1002_v37 = vld [vmem:[#allocation5 + $0x1e8] sm:$0xff] }
 0x106   : > { %1067 = vmatpush.msrb.mxu3 %v1002_v37  ;;  %v950_v42 = vld [vmem:[#allocation5 + $0x48] sm:$0xff]  ;;  %v960_v37 = vld [vmem:[#allocation5 + $0x98] sm:$0xff] }
 0x107   : > { %v1583_v47 = vadd.f32 %v737_v40, %v727_v44  ;;  %v1585_v48 = vadd.f32 %v738_v41, %v728_v46  ;;  %v966_v43 = vld [vmem:[#allocation5 + $0xc8] sm:$0xff]  ;;  %v985_v44 = vld [vmem:[#allocation5 + $0x160] sm:$0xff]  ;;  %1011 = vmatpush.msrb.mxu0 %v950_v42 }
 0x108   : > { %1031 = vmatpush.msrb.mxu1 %v966_v43  ;;  %1048 = vmatpush.msrb.mxu2 %v985_v44  ;;  %v990_v42 = vld [vmem:[#allocation5 + $0x188] sm:$0xff] }
 0x109   : > { %v1188_v49 = vmul.f32 -1.442695, %v1583_v47  ;;  %v1189_v50 = vmul.f32 -1.442695, %v1585_v48 }
 0x10b   : > { %1263 = vpow2.f32 %v1188_v49  ;;  %v698_v57 = vpop.f32.mrf.mxu2  ;;  %v721_v58 = vpop.f32.mrf.mxu3  ;;  %v1001_v49 = vld [vmem:[#allocation5 + $0x1e0] sm:$0xff] }
 0x10c   : > { %1265 = vpow2.f32 %v1189_v50  ;;  %v729_v59 = vadd.f32 %v698_v57, %v534_v51  ;;  %v730_v60 = vadd.f32 %v721_v58, %v557_v52  ;;  %v655_v61 = vpop.f32.mrf.mxu0  ;;  %v678_v62 = vpop.f32.mrf.mxu1  ;;  %1068 = vmatpush.msrb.mxu3 %v1001_v49  ;;  %v949_v52 = vld [vmem:[#allocation5 + $0x40] sm:$0xff]  ;;  %v995_v49 = vld [vmem:[#allocation5 + $0x1b0] sm:$0xff] }
 0x10d   : > { %v731_v63 = vadd.f32 %v655_v61, %v491_v55  ;;  %v732_v0 = vadd.f32 %v678_v62, %v514_v56  ;;  %v984_v55 = vld [vmem:[#allocation5 + $0x158] sm:$0xff]  ;;  %1012 = vmatpush.msrb.mxu0 %v949_v52 }
 0x10e   : > { %v1593_v3 = vadd.f32 %v739_v53, %v729_v59  ;;  %v1597_v4 = vadd.f32 %v740_v54, %v730_v60  ;;  %v1000_v59 = vld [vmem:[#allocation5 + $0x1d8] sm:$0xff]  ;;  %1049 = vmatpush.msrb.mxu2 %v984_v55  ;;  %v943_v55 = vld [vmem:[#allocation5 + $0x10] sm:$0xff] }
 0x10f   : > { %v1599_v5 = vadd.f32 %v737_v40, %v731_v63  ;;  %v1601_v6 = vadd.f32 %v738_v41, %v732_v0  ;;  %v560_v40 = vadd.f32 %v1579_v39, %v1572_v29  ;;  %1069 = vmatpush.msrb.mxu3 %v1000_v59  ;;  %v948_v62 = vld [vmem:[#allocation5 + $0x38] sm:$0xff] }
 0x110   : > { %v1190_v9 = vmul.f32 -1.442695, %v1593_v3  ;;  %v1191_v10 = vmul.f32 -1.442695, %v1597_v4  ;;  %v964_v63 = vld [vmem:[#allocation5 + $0xb8] sm:$0xff]  ;;  %1013 = vmatpush.msrb.mxu0 %v948_v62  ;;  %1050 = vmatpush.msrb.mxu2 %v983_v1 }
 0x111   : > { %v1264_v11 = vpop.eup %1263  ;;  %v1192_v16 = vmul.f32 -1.442695, %v1599_v5  ;;  %v1193_v18 = vmul.f32 -1.442695, %v1601_v6  ;;  %1070 = vmatpush.msrb.mxu3 %v999_v2 }
 0x112   : > { %v1266_v14 = vpop.eup %1265  ;;  %v1605_v15 = vadd.f32 1.0, %v1264_v11  ;;  %1267 = vpow2.f32 %v1190_v9  ;;  %v963_v11 = vld [vmem:[#allocation5 + $0xb0] sm:$0xff]  ;;  %1051 = vmatpush.msrb.mxu2 %v982_v12 }
 0x113   : > { %v1608_v17 = vadd.f32 1.0, %v1266_v14  ;;  %1269 = vpow2.f32 %v1191_v10  ;;  %v701_v19 = vpop.f32.mrf.mxu2  ;;  %v724_v36 = vpop.f32.mrf.mxu3  ;;  %v947_v10 = vld [vmem:[#allocation5 + $0x30] sm:$0xff]  ;;  %1071 = vmatpush.msrb.mxu3 %v998_v13 }
 0x114   : > { %1271 = vrcp.f32 %v1605_v15  ;;  %v733_v30 = vadd.f32 %v701_v19, %v537_v21  ;;  %v734_v39 = vadd.f32 %v724_v36, %v560_v40  ;;  %1014 = vmatpush.msrb.mxu0 %v947_v10  ;;  %v794_v19 = vand.u32 2147483647, %v1605_v15  ;;  %v944_v36 = vld [vmem:[#allocation5 + $0x18] sm:$0xff] }
 0x115   : > { %1273 = vrcp.f32 %v1608_v17  ;;  %v796_v20 = vand.u32 2147483648, %v1605_v15  ;;  %1072 = vmatpush.msrb.mxu3 %v997_v23  ;;  %vm790_vm2 = vweird.f32 %v1605_v15  ;;  %v809_v27 = vand.u32 2147483647, %v1608_v17  ;;  %v976_v23 = vld [vmem:[#allocation5 + $0x118] sm:$0xff] }
 0x116   : > { %1275 = vpow2.f32 %v1192_v16  ;;  %v1616_v34 = vadd.f32 %v739_v53, %v733_v30  ;;  %v965_v53 = vld [vmem:[#allocation5 + $0xc0] sm:$0xff]  ;;  %v1641_v9 = vadd.f32 %v740_v54, %v734_v39  ;;  %v962_v54 = vld [vmem:[#allocation5 + $0xa8] sm:$0xff]  ;;  %1015 = vmatpush.msrb.mxu0 %v946_v35  ;;  %v811_v30 = vand.u32 2147483648, %v1608_v17 }
 0x117   : > { %1277 = vpow2.f32 %v1193_v18  ;;  %1032 = vmatpush.msrb.mxu1 %v965_v53  ;;  %v981_v18 = vld [vmem:[#allocation5 + $0x140] sm:$0xff]  ;;  %vm805_vm4 = vweird.f32 %v1608_v17  ;;  %1073 = vmatpush.msrb.mxu3 %v996_v28  ;;  %vm1667_vm5 = vcmp.eq.f32.partialorder %v794_v19, 8.507059e+37  ;;  %v797_v39 = vor.u32 1.1754944e-38, %v796_v20  ;;  %v992_v20 = vld [vmem:[#allocation5 + $0x198] sm:$0xff] }
 0x118   : > { %v1268_v33 = vpop.eup %1267  ;;  %v1194_v58 = vmul.f32 -1.442695, %v1616_v34  ;;  %v1195_v24 = vmul.f32 -1.442695, %v1641_v9  ;;  %1052 = vmatpush.msrb.mxu2 %v981_v18  ;;  %1016 = vmatpush.msrb.mxu0 %v945_v25  ;;  %vm1689_vm8 = vcmp.eq.f32.partialorder %v809_v27, 8.507059e+37  ;;  %v993_v35 = vld [vmem:[#allocation5 + $0x1a0] sm:$0xff] }
 0x119   : > { %v1270_v38 = vpop.eup %1269  ;;  %v1620_v41 = vadd.f32 1.0, %v1268_v33  ;;  %1033 = vmatpush.msrb.mxu1 %v964_v63  ;;  %1074 = vmatpush.msrb.mxu3 %v995_v49  ;;  %v994_v63 = vld [vmem:[#allocation5 + $0x1a8] sm:$0xff]  ;;  %v991_v27 = vld [vmem:[#allocation5 + $0x190] sm:$0xff] }
 0x11a   : > { %v1622_v46 = vpop.eup %1271  ;;  %v1629_v29 = vadd.f32 1.0, %v1270_v38  ;;  %1053 = vmatpush.msrb.mxu2 %v980_v31  ;;  %v979_v38 = vld [vmem:[#allocation5 + $0x130] sm:$0xff]  ;;  %1017 = vmatpush.msrb.mxu0 %v944_v36 }
 0x11b   : > { %v1624_v50 = vpop.eup %1273  ;;  %v786_v51 = vmul.f32 %v1622_v46, %v1605_v15  ;;  %1279 = vrcp.f32 %v1620_v41  ;;  %1034 = vmatpush.msrb.mxu1 %v963_v11  ;;  %vm791_vm3 = vweird.f32 %v1622_v46  ;;  %v826_v33 = vand.u32 2147483648, %v1620_v41  ;;  %1075 = vmatpush.msrb.mxu3 %v994_v63  ;;  %v958_v11 = vld [vmem:[#allocation5 + $0x88] sm:$0xff] }
 0x11c   : > { %v1276_v56 = vpop.eup %1275  ;;  %v801_v57 = vmul.f32 %v1624_v50, %v1608_v17  ;;  %1281 = vrcp.f32 %v1629_v29  ;;  %vm806_vm6 = vweird.f32 %v1624_v50  ;;  %1054 = vmatpush.msrb.mxu2 %v979_v38  ;;  %vm1685_vm7 = vmor %vm790_vm2, %vm791_vm3  ;;  %1018 = vmatpush.msrb.mxu0 %v943_v55  ;;  %vm820_vm10 = vweird.f32 %v1620_v41 }
 0x11d   : > { %v1278_v60 = vpop.eup %1277  ;;  %v787_v61 = vsub.f32 1.0, %v786_v51  ;;  %v1635_v7 = vadd.f32 1.0, %v1276_v56  ;;  %1283 = vpow2.f32 %v1194_v58  ;;  %1035 = vmatpush.msrb.mxu1 %v962_v54  ;;  %v959_v56 = vld [vmem:[#allocation5 + $0x90] sm:$0xff]  ;;  %vm1706_vm9 = vmor %vm805_vm4, %vm806_vm6  ;;  %v1711_v2 = vor.u32 1.1754944e-38, %v826_v33  ;;  %v941_v54 = vld [vmem:[#allocation5] sm:$0xff]  ;;  %1076 = vmatpush.msrb.mxu3 %v993_v35 }
 0x11e   : > { %v802_v0 = vsub.f32 1.0, %v801_v57  ;;  %v1637_v8 = vadd.f32 1.0, %v1278_v60  ;;  %v978_v57 = vld [vmem:[#allocation5 + $0x128] sm:$0xff]  ;;  %v812_v60 = vor.u32 1.1754944e-38, %v811_v30  ;;  %v989_v58 = vld [vmem:[#allocation5 + $0x180] sm:$0xff] }
 0x11f   : > { %v788_v16 = vmul.f32 %v1622_v46, %v787_v61  ;;  %1285 = vrcp.f32 %v1635_v7  ;;  %1036 = vmatpush.msrb.mxu1 %v961_v26  ;;  %v854_v44 = vand.u32 2147483647, %v1635_v7  ;;  %v824_v61 = vand.u32 2147483647, %v1620_v41  ;;  %1055 = vmatpush.msrb.mxu2 %v978_v57  ;;  %v975_v26 = vld [vmem:[#allocation5 + $0x110] sm:$0xff]  ;;  %v973_v57 = vld [vmem:[#allocation5 + $0x100] sm:$0xff] }
 0x120   : > { %v803_v22 = vmul.f32 %v1624_v50, %v802_v0  ;;  %1287 = vrcp.f32 %v1637_v8  ;;  %vm850_vm11 = vweird.f32 %v1635_v7  ;;  %v871_v33 = vand.u32 2147483648, %v1637_v8  ;;  %1077 = vmatpush.msrb.mxu3 %v992_v20 }
 0x121   : > { %v1643_v14 = vpop.eup %1279  ;;  %v1662_v45 = vadd.f32 %v1622_v46, %v788_v16  ;;  %1037 = vmatpush.msrb.mxu1 %v960_v37  ;;  %1289 = vpow2.f32 %v1195_v24  ;;  %v977_v16 = vld [vmem:[#allocation5 + $0x120] sm:$0xff]  ;;  %vm1725_vm13 = vcmp.eq.f32.partialorder %v854_v44, 8.507059e+37  ;;  %vm865_vm1 = vweird.f32 %v1637_v8 }
 0x122   : > { %v1652_v21 = vmul.f32 %v1643_v14, %v1620_v41  ;;  %v1659_v32 = vpop.eup %1281  ;;  %v1672_v43 = vadd.f32 %v1624_v50, %v803_v22  ;;  %vm821_vm12 = vweird.f32 %v1643_v14  ;;  %1056 = vmatpush.msrb.mxu2 %v977_v16  ;;  %v957_v22 = vld [vmem:[#allocation5 + $0x80] sm:$0xff]  ;;  %1078 = vmatpush.msrb.mxu3 %v991_v27  ;;  %vm825_vm6 = vcmp.eq.f32.partialorder %v824_v61, 8.507059e+37 }
 0x123   : > { %v1284_v40 = vpop.eup %1283  ;;  %1038 = vmatpush.msrb.mxu1 %v959_v56  ;;  %v793_v15 = vsel %vm1685_vm7, %v1622_v46, %v1662_v45  ;;  %v831_v10 = vmul.f32 %v1659_v32, %v1629_v29  ;;  %v942_v46 = vld [vmem:[#allocation5 + $0x8] sm:$0xff]  ;;  %v869_v45 = vand.u32 2147483647, %v1637_v8  ;;  %vm1764_vm3 = vmor %vm820_vm10, %vm821_vm12  ;;  %vm835_vm7 = vweird.f32 %v1629_v29 }
 0x124   : > { %v817_v52 = vsub.f32 1.0, %v1652_v21  ;;  %v1679_v53 = vadd.f32 1.0, %v1284_v40  ;;  %v808_v17 = vsel %vm1706_vm9, %v1624_v50, %v1672_v43  ;;  %1019 = vmatpush.msrb.mxu0 %v942_v46  ;;  %v856_v50 = vand.u32 2147483648, %v1635_v7  ;;  %1057 = vmatpush.msrb.mxu2 %v976_v23  ;;  %v974_v40 = vld [vmem:[#allocation5 + $0x108] sm:$0xff] }
 0x125   : > { %v1676_v51 = vpop.eup %1285  ;;  %1039 = vmatpush.msrb.mxu1 %v958_v11  ;;  %v798_v21 = vsel %vm1667_vm5, %v797_v39, %v793_v15  ;;  %v813_v31 = vsel %vm1689_vm8, %v812_v60, %v808_v17  ;;  %v832_v28 = vsub.f32 1.0, %v831_v10  ;;  %1079 = vmatpush.msrb.mxu3 %v990_v42  ;;  %vm870_vm4 = vcmp.eq.f32.partialorder %v869_v45, 8.507059e+37 }
 0x126   : > { %v846_v62 = vmul.f32 %v1676_v51, %v1635_v7  ;;  %v1696_v0 = vpop.eup %1287  ;;  %1291 = vrcp.f32 %v1679_v53  ;;  %v818_v18 = vmul.f32 %v1643_v14, %v817_v52  ;;  %vm851_vm14 = vweird.f32 %v1676_v51  ;;  %1020 = vmatpush.msrb.mxu0 %v941_v54  ;;  %1058 = vmatpush.msrb.mxu2 %v975_v26 }
 0x127   : > { %v861_v13 = vmul.f32 %v1696_v0, %v1637_v8  ;;  %1040 = vmatpush.msrb.mxu1 %v957_v22  ;;  %v1290_v30 = vpop.eup %1289  ;;  %vm866_vm15 = vweird.f32 %v1696_v0  ;;  %v905_v44 = vmul.f32 %v798_v21, %v1583_v47  ;;  %vm852_vm0 = vmor %vm850_vm11, %vm851_vm14  ;;  %v857_v39 = vor.u32 1.1754944e-38, %v856_v50  ;;  %1080 = vmatpush.msrb.mxu3 %v989_v58 }
 0x128   : > { %v847_v12 = vsub.f32 1.0, %v846_v62  ;;  %v1741_v38 = vadd.f32 1.0, %v1290_v30  ;;  %v819_v49 = vadd.f32 %v1643_v14, %v818_v18  ;;  %v906_v52 = vmul.f32 %v813_v31, %v1585_v48  ;;  %vm867_vm2 = vmor %vm865_vm1, %vm866_vm15  ;;  %1059 = vmatpush.msrb.mxu2 %v974_v40 }
 0x129   : > { %v862_v25 = vsub.f32 1.0, %v861_v13  ;;  %v833_v59 = vmul.f32 %v1659_v32, %v832_v28  ;;  %v872_v8 = vor.u32 1.1754944e-38, %v871_v33  ;;  %v884_v1 = vand.u32 2147483647, %v1679_v53 }
 0x12a   : > { %v848_v24 = vmul.f32 %v1676_v51, %v847_v12  ;;  %1293 = vrcp.f32 %v1741_v38  ;;  %v823_v63 = vsel %vm1764_vm3, %v1643_v14, %v819_v49  ;;  %v886_v10 = vand.u32 2147483648, %v1679_v53  ;;  %1060 = vmatpush.msrb.mxu2 %v973_v57 }
 0x12b   : > { %v863_v37 = vmul.f32 %v1696_v0, %v862_v25  ;;  %vm880_vm8 = vweird.f32 %v1679_v53  ;;  %v834_v16 = vadd.f32 %v1659_v32, %v833_v59  ;;  %vm836_vm9 = vweird.f32 %v1659_v32 }
 0x12c   : > { %v849_v36 = vadd.f32 %v1676_v51, %v848_v24  ;;  %v1292_v43 = vpop.eup %1291  ;;  %vm885_vm11 = vcmp.eq.f32.partialorder %v884_v1, 8.507059e+37  ;;  %v841_v18 = vand.u32 2147483648, %v1629_v29  ;;  %vm1789_vm12 = vmor %vm835_vm7, %vm836_vm9  ;;  %v899_v24 = vand.u32 2147483647, %v1741_v38 }
 0x12d   : > { %v864_v56 = vadd.f32 %v1696_v0, %v863_v37  ;;  %v876_v47 = vmul.f32 %v1292_v43, %v1679_v53  ;;  %vm881_vm5 = vweird.f32 %v1292_v43  ;;  %v901_v25 = vand.u32 2147483648, %v1741_v38 }
 0x12e   : > { %v853_v55 = vsel %vm852_vm0, %v1676_v51, %v849_v36  ;;  %vm882_vm10 = vmor %vm880_vm8, %vm881_vm5  ;;  %v842_v31 = vor.u32 1.1754944e-38, %v841_v18  ;;  %vm895_vm15 = vweird.f32 %v1741_v38  ;;  %vm900_vm1 = vcmp.eq.f32.partialorder %v899_v24, 8.507059e+37 }
 0x12f   : > { %v858_v7 = vsel %vm1725_vm13, %v857_v39, %v853_v55  ;;  %v868_v60 = vsel %vm867_vm2, %v1696_v0, %v864_v56  ;;  %v877_v62 = vsub.f32 1.0, %v876_v47 }
 0x130   : > { %v909_v51 = vmul.f32 %v858_v7, %v1599_v5  ;;  %v873_v15 = vsel %vm870_vm4, %v872_v8, %v868_v60  ;;  %v828_v5 = vsel %vm825_vm6, %v1711_v2, %v823_v63  ;;  %v1294_v13 = vpop.eup %1293  ;;  %v839_v2 = vand.u32 2147483647, %v1629_v29 }
 0x131   : > { %v910_v11 = vmul.f32 %v873_v15, %v1601_v6  ;;  %v878_v17 = vmul.f32 %v1292_v43, %v877_v62  ;;  %v887_v6 = vor.u32 1.1754944e-38, %v886_v10  ;;  %v891_v54 = vmul.f32 %v1294_v13, %v1741_v38 }
 0x132   : > { %v913_v46 = vadd.f32 %v909_v51, %v905_v44  ;;  %v907_v53 = vmul.f32 %v828_v5, %v1593_v3  ;;  %v838_v3 = vsel %vm1789_vm12, %v1659_v32, %v834_v16  ;;  %vm896_vm13 = vweird.f32 %v1294_v13 }
 0x133   : > { %v920_v0 = vadd.f32 %v910_v11, %v906_v52  ;;  %v879_v12 = vadd.f32 %v1292_v43, %v878_v17  ;;  %v892_v21 = vsub.f32 1.0, %v891_v54  ;;  %vm840_vm14 = vcmp.eq.f32.partialorder %v839_v2, 8.507059e+37  ;;  %vm897_vm0 = vmor %vm895_vm15, %vm896_vm13 }
 0x134   : > { %v914_v14 = vrot.slane %v913_v46, 4  ;;  %v843_v36 = vsel %vm840_vm14, %v842_v31, %v838_v3  ;;  %v902_v32 = vor.u32 1.1754944e-38, %v901_v25 }
 0x135   : > { %v921_v41 = vrot.slane %v920_v0, 4  ;;  %v883_v61 = vsel %vm882_vm10, %v1292_v43, %v879_v12  ;;  %v893_v27 = vmul.f32 %v1294_v13, %v892_v21  ;;  %v908_v49 = vmul.f32 %v843_v36, %v1597_v4 }
 0x136   : > { %v915_v35 = vadd.f32 %v914_v14, %v913_v46  ;;  %v888_v19 = vsel %vm885_vm11, %v887_v6, %v883_v61 }
 0x137   : > { %v922_v23 = vadd.f32 %v921_v41, %v920_v0  ;;  %v911_v20 = vmul.f32 %v888_v19, %v1616_v34  ;;  %v894_v34 = vadd.f32 %v1294_v13, %v893_v27 }
 0x138   : > { %v916_v22 = vrot.slane %v915_v35, 2 }
 0x139   : > { %v923_v26 = vrot.slane %v922_v23, 2  ;;  %v927_v29 = vadd.f32 %v911_v20, %v907_v53  ;;  %v898_v40 = vsel %vm897_vm0, %v1294_v13, %v894_v34 }
 0x13a   : > { %v917_v30 = vadd.f32 %v916_v22, %v915_v35  ;;  %v903_v44 = vsel %vm900_vm1, %v902_v32, %v898_v40 }
 0x13b   : > { %v928_v28 = vrot.slane %v927_v29, 4  ;;  %v924_v33 = vadd.f32 %v923_v26, %v922_v23  ;;  %v912_v52 = vmul.f32 %v903_v44, %v1641_v9 }
 0x13c   : > { %v918_v45 = vrot.slane %v917_v30, 1 }
 0x13d   : > { %v929_v37 = vadd.f32 %v928_v28, %v927_v29  ;;  %v925_v43 = vrot.slane %v924_v33, 1  ;;  %v934_v55 = vadd.f32 %v912_v52, %v908_v49 }
 0x13e   : > { %v919_v42 = vadd.f32 %v918_v45, %v917_v30 }
 0x13f   : > { %v930_v39 = vrot.slane %v929_v37, 2  ;;  %v926_v38 = vadd.f32 %v925_v43, %v924_v33  ;;  %v935_v47 = vrot.slane %v934_v55, 4 }
 0x140   : > { %1021 = vmatmul.f32.vlgmr.msrb.gmra.mxu0 %v919_v42 }
 0x141   : > { %1041 = vmatmul.f32.vlgmr.msrb.gmra.mxu1 %v926_v38  ;;  %v931_v56 = vadd.f32 %v930_v39, %v929_v37  ;;  %v936_v58 = vadd.f32 %v935_v47, %v934_v55 }
 0x143   : > { %v932_v57 = vrot.slane %v931_v56, 1  ;;  %v937_v7 = vrot.slane %v936_v58, 2 }
 0x145   : > { %v933_v59 = vadd.f32 %v932_v57, %v931_v56  ;;  %v938_v8 = vadd.f32 %v937_v7, %v936_v58 }
 0x147   : > { %1061 = vmatmul.f32.vlgmr.msrb.gmra.mxu2 %v933_v59  ;;  %v939_v48 = vrot.slane %v938_v8, 1 }
 0x149   : > { %v940_v51 = vadd.f32 %v939_v48, %v938_v8 }
 0x14b   : > { %1081 = vmatmul.f32.vlgmr.msrb.gmra.mxu3 %v940_v51 }
 0x1bd   : > { %v1022_v4 = vpop.f32.mrf.mxu0 }
 0x1be   : > { %v1042_v60 = vpop.f32.mrf.mxu1 }
 0x1bf   : > { %v1043_v62 = vadd.f32 %v1042_v60, %v1022_v4 }
 0x1ca   : > { %v1062_v9 = vpop.f32.mrf.mxu2 }
 0x1cb   : > { %v1063_v63 = vadd.f32 %v1062_v9, %v1043_v62 }
 0x1ce   : > { %v1082_v15 = vpop.f32.mrf.mxu3 }
 0x1cf   : > { %v1083_v1 = vadd.f32 %v1082_v15, %v1063_v63 }
 0x1d1   : > { %1085 = vst [vmem:[%s223_s10] sm:$0x1] %v1083_v1 }
 0x1d2   : > { %1382 = shalt.err (!%p1379_p8)
}
 0x1d3   : > { %1207 = dma.vmem_to_hbm [thread:$0]  (%p1496_p5), %s1098_s11, 16, %s1100_s12, %s1087_s13  }
 0x1d4 PF: > { %p1224_p9 = scmp.ge.s32.totalorder %s1425_s18, 2  ;;  %s1111_s29 = sand.u32 1, %s1413_s15  }
 0x1d5   : > { %s1112_s30 = scalar_lea.sflag [#allocation4], %s1111_s29 }
 0x1d6   : > { %p1217_p10 = pnand %p1224_p9, %p1500_p6 }
 0x1d8   : > { %p1218_p11 = pneg %p1217_p10 }
 0x1da   : > { %1408 = dma.done.wait (%p1218_p11), %s1112_s30, 16  }
 0x1db   : > { %1410 = vsyncadd (%p1218_p11), %s1112_s30, 4294967280  ;;  %p16_p12 = scmp.ge.s32.totalorder %s1483_s21, 4   ;;  %s1857_s15 = smov %s1417_s16 }
 0x1dc   : > { %s1858_s16 = smov %s1421_s17  ;;  %s1859_s17 = smov %s1494_s24 }
 0x1dd   : > { %s1860_s18 = smov %s1483_s21  ;;  %18 = sbr.rel (!%p16_p12) target bundleno = 5 (0x5), region = 82 }
 0x1e2   :  { %1117 = vsyncpa [#allocation3], 1 }
 0x1e3   :  { %1119 = vsyncpa [#allocation3 + $0x1], 1 }
 0x1e4   :  { %1120 = vsyncpa [#allocation6], 1 }
 0x1e5   :  { %1121 = vsyncpa [#allocation4], 1 }
 0x1e6   :  { %1123 = vsyncpa [#allocation4 + $0x1], 1 }

</bundles_post_ra>
